<compile_context>
chip_gen: v6e
topology: v6e:2x2x1
jax: 0.10.0
libtpu: 0.0.40
codegen_flags: <defaults>
</compile_context>

<pallas_src>
import jax
import jax.numpy as jnp
from jax.experimental import pallas as pl
from jax.experimental.pallas import tpu as pltpu

EPS = 1e-3


def conv_bn_add_kernel(x_ref, w_ref, gamma_ref, beta_ref, res_ref, o_ref):
    # x_ref:      [Cin,  P]
    # w_ref:      [Cout, Cin]
    # gamma/beta: [Cout, 1]
    # res_ref:    [Cout, P]
    # o_ref:      [Cout, P]
    x = x_ref[...]
    w = w_ref[...]

    # 1x1 conv == matmul on the MXU (f32 accumulate).
    y = jnp.dot(w, x, preferred_element_type=jnp.float32)        # [Cout, P]

    # Single-pass BN statistics over the P (lane) axis per channel.
    p = y.shape[1]
    inv_p = 1.0 / p
    s1 = jnp.sum(y, axis=1, keepdims=True)                        # [Cout, 1]
    s2 = jnp.sum(y * y, axis=1, keepdims=True)                    # [Cout, 1]
    mean = s1 * inv_p
    var = s2 * inv_p - mean * mean                                # biased var

    # Fold BN affine into a single scale/shift epilogue.
    scale = gamma_ref[...] * jax.lax.rsqrt(var + EPS)             # [Cout, 1]
    shift = beta_ref[...] - mean * scale                          # [Cout, 1]

    o_ref[...] = y * scale + shift + res_ref[...]


def conv_bn_add(x_nchw, w_oihw, gamma, beta, res_nchw):
    n, cin, h, wd = x_nchw.shape
    cout = w_oihw.shape[0]
    p = n * h * wd

    if n == 1:
        # Pure reshapes (free) — no transpose kernels in the wrapper.
        x2d = x_nchw.reshape(cin, p)
        r2d = res_nchw.reshape(cout, p)
    else:
        # General fallback (not hit for this module's N=1 shapes).
        x2d = jnp.transpose(x_nchw, (1, 0, 2, 3)).reshape(cin, p)
        r2d = jnp.transpose(res_nchw, (1, 0, 2, 3)).reshape(cout, p)

    w2d = w_oihw.reshape(cout, cin)        # [Cout, Cin, 1, 1] -> [Cout, Cin]
    g2d = gamma.reshape(cout, 1)
    b2d = beta.reshape(cout, 1)

    flops = 2 * p * cin * cout
    bytes_accessed = 4 * (p * cin + cin * cout + 2 * p * cout + 2 * cout)
    vmem_spec = pl.BlockSpec(memory_space=pltpu.MemorySpace.VMEM)

    out2d = pl.pallas_call(
        conv_bn_add_kernel,
        out_shape=jax.ShapeDtypeStruct((cout, p), jnp.float32),
        in_specs=[vmem_spec] * 5,
        out_specs=vmem_spec,
        cost_estimate=pl.CostEstimate(
            flops=flops, transcendentals=cout, bytes_accessed=bytes_accessed
        ),
    )(x2d, w2d, g2d, b2d, r2d)

    if n == 1:
        return out2d.reshape(1, cout, h, wd)
    return jnp.transpose(out2d.reshape(cout, n, h, wd), (1, 0, 2, 3))


def reference(x_nchw, w_oihw, gamma, beta, res_nchw):
    # Pure-JAX reference of the same forward pass (training-mode BN).
    y = jax.lax.conv_general_dilated(
        x_nchw, w_oihw, window_strides=(1, 1), padding="VALID",
        dimension_numbers=("NCHW", "OIHW", "NCHW"),
    )
    mean = jnp.mean(y, axis=(0, 2, 3), keepdims=True)
    var = jnp.mean((y - mean) ** 2, axis=(0, 2, 3), keepdims=True)
    y_hat = (y - mean) / jnp.sqrt(var + EPS)
    out = y_hat * gamma.reshape(1, -1, 1, 1) + beta.reshape(1, -1, 1, 1)
    return out + res_nchw


if __name__ == "__main__":
    key = jax.random.PRNGKey(0)
    k1, k2, k3 = jax.random.split(key, 3)

    N, CIN, COUT, H, W = 1, 184, 80, 14, 14

    x102 = jax.random.normal(k1, (N, CIN, H, W), dtype=jnp.float32)
    x96 = jax.random.normal(k2, (N, COUT, H, W), dtype=jnp.float32)

    # Conv2d(184, 80, 1x1, bias=False) weight; BN affine params (PyTorch init:
    # gamma = 1, beta = 0).  Deterministic in-script init.
    w = jax.random.normal(k3, (COUT, CIN, 1, 1), dtype=jnp.float32) * 0.05
    gamma = jnp.ones((COUT,), dtype=jnp.float32)
    beta = jnp.zeros((COUT,), dtype=jnp.float32)

    out = conv_bn_add(x102, w, gamma, beta, x96)
    out = jax.block_until_ready(out)

    ref = reference(x102, w, gamma, beta, x96)
    assert out.shape == (N, COUT, H, W)
    assert jnp.allclose(out, ref, atol=1e-4, rtol=1e-4)

    print("KERNEL_OK")
</pallas_src>

<mosaic_0001>
module attributes {stable_mosaic.version = 11 : i64} {
  func.func @conv_bn_add_kernel(%arg0: memref<184x196xf32, #tpu.memory_space<vmem>>, %arg1: memref<80x184xf32, #tpu.memory_space<vmem>>, %arg2: memref<80x1xf32, #tpu.memory_space<vmem>>, %arg3: memref<80x1xf32, #tpu.memory_space<vmem>>, %arg4: memref<80x196xf32, #tpu.memory_space<vmem>>, %arg5: memref<80x196xf32, #tpu.memory_space<vmem>>) attributes {dimension_semantics = [], scalar_prefetch = 0 : i64, scratch_operands = 0 : i64, tpu.core_type = #tpu.core_type<tc>} {
    %c0 = arith.constant 0 : index
    %c0_0 = arith.constant 0 : index
    %0 = vector.load %arg0[%c0, %c0_0] : memref<184x196xf32, #tpu.memory_space<vmem>>, vector<184x196xf32>
    %c0_1 = arith.constant 0 : index
    %c0_2 = arith.constant 0 : index
    %1 = vector.load %arg1[%c0_1, %c0_2] : memref<80x184xf32, #tpu.memory_space<vmem>>, vector<80x184xf32>
    %cst = arith.constant dense<0.000000e+00> : vector<80x196xf32>
    %2 = tpu.matmul %1, %0, %cst {dimension_numbers = #tpu.dot_dimension_numbers<[1], [0], [0], [1], [0, 0, 1, 1], [], []>} : vector<80x184xf32>, vector<184x196xf32>, vector<80x196xf32> -> vector<80x196xf32>
    %cst_3 = arith.constant dense<0.000000e+00> : vector<80xf32>
    %3 = vector.multi_reduction <add>, %2, %cst_3 [1] : vector<80x196xf32> to vector<80xf32>
    %4 = vector.shape_cast %3 : vector<80xf32> to vector<80x1xf32>
    %5 = arith.mulf %2, %2 : vector<80x196xf32>
    %cst_4 = arith.constant dense<0.000000e+00> : vector<80xf32>
    %6 = vector.multi_reduction <add>, %5, %cst_4 [1] : vector<80x196xf32> to vector<80xf32>
    %7 = vector.shape_cast %6 : vector<80xf32> to vector<80x1xf32>
    %cst_5 = arith.constant 0.00510204071 : f32
    %8 = vector.broadcast %cst_5 : f32 to vector<80x1xf32>
    %9 = arith.mulf %4, %8 : vector<80x1xf32>
    %cst_6 = arith.constant 0.00510204071 : f32
    %10 = vector.broadcast %cst_6 : f32 to vector<80x1xf32>
    %11 = arith.mulf %7, %10 : vector<80x1xf32>
    %12 = arith.mulf %9, %9 : vector<80x1xf32>
    %13 = arith.subf %11, %12 : vector<80x1xf32>
    %c0_7 = arith.constant 0 : index
    %c0_8 = arith.constant 0 : index
    %14 = vector.load %arg2[%c0_7, %c0_8] : memref<80x1xf32, #tpu.memory_space<vmem>>, vector<80x1xf32>
    %cst_9 = arith.constant 1.000000e-03 : f32
    %15 = vector.broadcast %cst_9 : f32 to vector<80x1xf32>
    %16 = arith.addf %13, %15 : vector<80x1xf32>
    %17 = math.rsqrt %16 : vector<80x1xf32>
    %18 = arith.mulf %14, %17 : vector<80x1xf32>
    %c0_10 = arith.constant 0 : index
    %c0_11 = arith.constant 0 : index
    %19 = vector.load %arg3[%c0_10, %c0_11] : memref<80x1xf32, #tpu.memory_space<vmem>>, vector<80x1xf32>
    %20 = arith.mulf %9, %18 : vector<80x1xf32>
    %21 = arith.subf %19, %20 : vector<80x1xf32>
    %22 = vector.broadcast %18 : vector<80x1xf32> to vector<80x196xf32>
    %23 = arith.mulf %2, %22 : vector<80x196xf32>
    %24 = vector.broadcast %21 : vector<80x1xf32> to vector<80x196xf32>
    %25 = arith.addf %23, %24 : vector<80x196xf32>
    %c0_12 = arith.constant 0 : index
    %c0_13 = arith.constant 0 : index
    %26 = vector.load %arg4[%c0_12, %c0_13] : memref<80x196xf32, #tpu.memory_space<vmem>>, vector<80x196xf32>
    %27 = arith.addf %25, %26 : vector<80x196xf32>
    %c0_14 = arith.constant 0 : index
    %c0_15 = arith.constant 0 : index
    %28 = vector.load %arg5[%c0_14, %c0_15] : memref<80x196xf32, #tpu.memory_space<vmem>>, vector<80x196xf32>
    tpu.vector_store %arg5[%c0_14, %c0_15], %27 {strides = array<i32>} : memref<80x196xf32, #tpu.memory_space<vmem>>, vector<80x196xf32>,
    return
  }
}

</mosaic_0001>

<bundles_post_ra>
// kernel: tpu_custom_call.1
= control target key start
LH: loop header
LB: loop body
LE: loop exit
PB: predicated region body
PF: predicated region fallthrough
CT: control target
= control target key end

     0   :  { %10 = vsyncpa [#allocation3], 0  ;;  %s1219_s0 = inlined_call_operand.hbm [shape: f32[184,196], index: 0, kind: input, shape index: {}]   ;;  %s1220_s1 = inlined_call_operand.vmem [shape: f32[80,184], index: 1, kind: input, shape index: {}]   ;;  %s1221_s2 = inlined_call_operand.vmem [shape: f32[80,1], index: 2, kind: input, shape index: {}]   ;;  %s1222_s3 = inlined_call_operand.vmem [shape: f32[80,1], index: 3, kind: input, shape index: {}]   ;;  %s1223_s4 = inlined_call_operand.hbm [shape: f32[80,196], index: 4, kind: input, shape index: {}]   ;;  %s1224_s5 = inlined_call_operand.hbm [shape: f32[80,196], index: 5, kind: output, shape index: {}]  }
   0x1   :  { %11 = vsyncpa [#allocation6], 0 }
   0x2   :  { %12 = vsyncpa [#allocation4], 0  ;;  %s850_s18 = smov [#allocation2]  }
   0x3   :  { %s18_s19 = sshll.u32 %s850_s18, 4  ;;  %s19_s19 = int_to_ptr.vmem [resolvable:$true] %s18_s19 }
   0x4   :  { %s792_s20 = scalar_lea.vmem %s19_s19, 5888  ;;  %p797_p1 = scmp.lt.s32.totalorder %s19_s19, %s19_s19 }
   0x5   :  { %p793_p0 = scmp.ne.s32.totalorder %s19_s19, %s792_s20  ;;  %p798_p2 = scmp.lt.s32.totalorder %s792_s20, %s792_s20 }
   0x7   :  { %p799_p3 = por %p798_p2, %p797_p1 }
   0x9   :  { %p800_p4 = pnand %p799_p3, %p793_p0 }
   0xb   :  { %803 = shalt.err (!%p800_p4)
}
   0xc   :  { %s851_s21 = smov 256   ;;  %s852_s22 = smov 16  }
   0xd   :  { %24 = dma.hbm_to_vmem [thread:$0]  %s1219_s0, 5888, %s19_s19, [#allocation3], %s851_s21, %s851_s21, %s852_s22  }
   0xe   :  { %s853_s25 = smov [#allocation5]  }
   0xf   :  { %s36_s26 = sshll.u32 %s853_s25, 4  ;;  %s37_s26 = int_to_ptr.vmem [resolvable:$true] %s36_s26 }
  0x10   :  { %s812_s27 = scalar_lea.vmem %s37_s26, 2560  ;;  %p817_p6 = scmp.lt.s32.totalorder %s37_s26, %s37_s26 }
  0x11   :  { %p813_p5 = scmp.ne.s32.totalorder %s37_s26, %s812_s27  ;;  %p818_p7 = scmp.lt.s32.totalorder %s812_s27, %s812_s27 }
  0x13   :  { %p819_p8 = por %p818_p7, %p817_p6 }
  0x15   :  { %p820_p9 = pnand %p819_p8, %p813_p5 }
  0x17   :  { %823 = shalt.err (!%p820_p9)
}
  0x18   :  { %42 = dma.hbm_to_vmem [thread:$0]  %s1223_s4, 2560, %s37_s26, [#allocation6], %s851_s21, %s851_s21, %s852_s22  }
  0x19   :  { %844 = dma.done.wait [#allocation3], 5888  }
  0x1a   :  { %845 = vsyncadd [#allocation3], 4294961408 }
  0x1b   :  { %846 = dma.done.wait [#allocation6], 2560  }
  0x1c   :  { %847 = vsyncadd [#allocation6], 4294964736  ;;  %v80_v0 = vld [vmem:[#allocation2 + $0xf8] sm:$0xff]  ;;  %v79_v1 = vld [vmem:[#allocation2 + $0xf0] sm:$0xff]  ;;  %vm115_vm0 = vcmask 457728   ;;  %vm271_vm1 = vcmask 556032  }
  0x1d   :  { %v78_v2 = vld [vmem:[#allocation2 + $0xe8] sm:$0xff]  ;;  %146 = vmatprep.subr.mxu0 %v80_v0  ;;  %710 = vmatprep.subr.mxu1 %v80_v0  ;;  %v77_v3 = vld [vmem:[#allocation2 + $0xe0] sm:$0xff]  ;;  %v76_v4 = vld [vmem:[#allocation2 + $0xd8] sm:$0xff] }
  0x1e   :  { %147 = vmatpush1.msra.mxu0 %v79_v1  ;;  %733 = vmatpush1.msra.mxu1 %v79_v1  ;;  %v75_v5 = vld [vmem:[#allocation2 + $0xd0] sm:$0xff]  ;;  %v74_v6 = vld [vmem:[#allocation2 + $0xc8] sm:$0xff]  ;;  %v73_v7 = vld [vmem:[#allocation2 + $0xc0] sm:$0xff] }
  0x1f   :  { %148 = vmatprep.subr.mxu0 %v78_v2  ;;  %711 = vmatprep.subr.mxu1 %v78_v2  ;;  %v72_v8 = vld [vmem:[#allocation2 + $0xb8] sm:$0xff]  ;;  %v71_v9 = vld [vmem:[#allocation2 + $0xb0] sm:$0xff]  ;;  %v70_v10 = vld [vmem:[#allocation2 + $0xa8] sm:$0xff] }
  0x20   :  { %149 = vmatpush1.msra.mxu0 %v77_v3  ;;  %734 = vmatpush1.msra.mxu1 %v77_v3  ;;  %v69_v11 = vld [vmem:[#allocation2 + $0xa0] sm:$0xff]  ;;  %v68_v12 = vld [vmem:[#allocation2 + $0x98] sm:$0xff]  ;;  %v67_v13 = vld [vmem:[#allocation2 + $0x90] sm:$0xff] }
  0x21   :  { %150 = vmatprep.subr.mxu0 %v76_v4  ;;  %712 = vmatprep.subr.mxu1 %v76_v4  ;;  %v66_v14 = vld [vmem:[#allocation2 + $0x88] sm:$0xff]  ;;  %v65_v15 = vld [vmem:[#allocation2 + $0x80] sm:$0xff]  ;;  %v64_v16 = vld [vmem:[#allocation2 + $0x78] sm:$0xff] }
  0x22   :  { %151 = vmatpush1.msra.mxu0 %v75_v5  ;;  %735 = vmatpush1.msra.mxu1 %v75_v5  ;;  %v63_v17 = vld [vmem:[#allocation2 + $0x70] sm:$0xff]  ;;  %v62_v18 = vld [vmem:[#allocation2 + $0x68] sm:$0xff]  ;;  %v61_v19 = vld [vmem:[#allocation2 + $0x60] sm:$0xff] }
  0x23   :  { %152 = vmatprep.subr.mxu0 %v74_v6  ;;  %713 = vmatprep.subr.mxu1 %v74_v6  ;;  %v60_v20 = vld [vmem:[#allocation2 + $0x58] sm:$0xff]  ;;  %v59_v21 = vld [vmem:[#allocation2 + $0x50] sm:$0xff]  ;;  %v58_v22 = vld [vmem:[#allocation2 + $0x48] sm:$0xff] }
  0x24   :  { %153 = vmatpush1.msra.mxu0 %v73_v7  ;;  %736 = vmatpush1.msra.mxu1 %v73_v7  ;;  %v57_v23 = vld [vmem:[#allocation2 + $0x40] sm:$0xff]  ;;  %v56_v24 = vld [vmem:[#allocation2 + $0x38] sm:$0xff]  ;;  %v55_v25 = vld [vmem:[#allocation2 + $0x30] sm:$0xff] }
  0x25   :  { %154 = vmatprep.subr.mxu0 %v72_v8  ;;  %714 = vmatprep.subr.mxu1 %v72_v8  ;;  %v54_v26 = vld [vmem:[#allocation2 + $0x28] sm:$0xff]  ;;  %v53_v27 = vld [vmem:[#allocation2 + $0x20] sm:$0xff]  ;;  %v52_v28 = vld [vmem:[#allocation2 + $0x18] sm:$0xff] }
  0x26   :  { %155 = vmatpush1.msra.mxu0 %v71_v9  ;;  %737 = vmatpush1.msra.mxu1 %v71_v9  ;;  %v51_v29 = vld [vmem:[#allocation2 + $0x10] sm:$0xff]  ;;  %v50_v30 = vld [vmem:[#allocation2 + $0x8] sm:$0xff]  ;;  %v49_v31 = vld [vmem:[#allocation2] sm:$0xff] }
  0x27   :  { %156 = vmatprep.subr.mxu0 %v70_v10  ;;  %715 = vmatprep.subr.mxu1 %v70_v10  ;;  %v94_v32 = vld [vmem:[#allocation2 + $0x168] sm:$0xff]  ;;  %v93_v33 = vld [vmem:[#allocation2 + $0x160] sm:$0xff]  ;;  %v92_v34 = vld [vmem:[#allocation2 + $0x158] sm:$0xff] }
  0x28   :  { %157 = vmatpush1.msra.mxu0 %v69_v11  ;;  %738 = vmatpush1.msra.mxu1 %v69_v11  ;;  %v91_v35 = vld [vmem:[#allocation2 + $0x150] sm:$0xff]  ;;  %v90_v36 = vld [vmem:[#allocation2 + $0x148] sm:$0xff]  ;;  %v89_v37 = vld [vmem:[#allocation2 + $0x140] sm:$0xff] }
  0x29   :  { %158 = vmatprep.subr.mxu0 %v68_v12  ;;  %716 = vmatprep.subr.mxu1 %v68_v12  ;;  %v88_v38 = vld [vmem:[#allocation2 + $0x138] sm:$0xff]  ;;  %v87_v39 = vld [vmem:[#allocation2 + $0x130] sm:$0xff]  ;;  %v86_v40 = vld [vmem:[#allocation2 + $0x128] sm:$0xff] }
  0x2a   :  { %159 = vmatpush1.msra.mxu0 %v67_v13  ;;  %739 = vmatpush1.msra.mxu1 %v67_v13  ;;  %v85_v41 = vld [vmem:[#allocation2 + $0x120] sm:$0xff]  ;;  %v84_v42 = vld [vmem:[#allocation2 + $0x118] sm:$0xff]  ;;  %v83_v43 = vld [vmem:[#allocation2 + $0x110] sm:$0xff] }
  0x2b   :  { %160 = vmatprep.subr.mxu0 %v66_v14  ;;  %717 = vmatprep.subr.mxu1 %v66_v14  ;;  %v82_v44 = vld [vmem:[#allocation2 + $0x108] sm:$0xff]  ;;  %v81_v45 = vld [vmem:[#allocation2 + $0x100] sm:$0xff]  ;;  %v106_v47 = vld [vmem:[%s1220_s1 + $0x58] sm:$0xff] }
  0x2c   :  { %161 = vmatpush1.msra.mxu0 %v65_v15  ;;  %740 = vmatpush1.msra.mxu1 %v65_v15  ;;  %v96_v46 = vld [vmem:[%s1220_s1 + $0x8] sm:$0xff]  ;;  %v95_v48 = vld [vmem:[%s1220_s1] sm:$0xff]  ;;  %v105_v49 = vld [vmem:[%s1220_s1 + $0x50] sm:$0xff] }
  0x2d   :  { %162 = vmatprep.subr.mxu0 %v64_v16  ;;  %718 = vmatprep.subr.mxu1 %v64_v16  ;;  %v98_v50 = vld [vmem:[%s1220_s1 + $0x18] sm:$0xff]  ;;  %v108_v51 = vld [vmem:[%s1220_s1 + $0x68] sm:$0xff]  ;;  %v97_v52 = vld [vmem:[%s1220_s1 + $0x10] sm:$0xff] }
  0x2e   :  { %163 = vmatpush1.msra.mxu0 %v63_v17  ;;  %741 = vmatpush1.msra.mxu1 %v63_v17  ;;  %v107_v53 = vld [vmem:[%s1220_s1 + $0x60] sm:$0xff]  ;;  %v100_v54 = vld [vmem:[%s1220_s1 + $0x28] sm:$0xff]  ;;  %v110_v55 = vld [vmem:[%s1220_s1 + $0x78] sm:$0xff] }
  0x2f   :  { %164 = vmatprep.subr.mxu0 %v62_v18  ;;  %719 = vmatprep.subr.mxu1 %v62_v18  ;;  %v99_v56 = vld [vmem:[%s1220_s1 + $0x20] sm:$0xff]  ;;  %v109_v57 = vld [vmem:[%s1220_s1 + $0x70] sm:$0xff]  ;;  %v102_v58 = vld [vmem:[%s1220_s1 + $0x38] sm:$0xff] }
  0x30   :  { %165 = vmatpush1.msra.mxu0 %v61_v19  ;;  %742 = vmatpush1.msra.mxu1 %v61_v19  ;;  %v112_v59 = vld [vmem:[%s1220_s1 + $0x88] sm:$0xff]  ;;  %v101_v60 = vld [vmem:[%s1220_s1 + $0x30] sm:$0xff]  ;;  %v111_v61 = vld [vmem:[%s1220_s1 + $0x80] sm:$0xff] }
  0x31   :  { %166 = vmatprep.subr.mxu0 %v60_v20  ;;  %720 = vmatprep.subr.mxu1 %v60_v20  ;;  %v104_v62 = vld [vmem:[%s1220_s1 + $0x48] sm:$0xff]  ;;  %v114_v63 = vld [vmem:[%s1220_s1 + $0x98] sm:$0xff]  ;;  %v103_v0 = vld [vmem:[%s1220_s1 + $0x40] sm:$0xff] }
  0x32   :  { %167 = vmatpush1.msra.mxu0 %v59_v21  ;;  %743 = vmatpush1.msra.mxu1 %v59_v21  ;;  %v113_v1 = vld [vmem:[%s1220_s1 + $0x90] sm:$0xff] }
  0x33   :  { %168 = vmatprep.subr.mxu0 %v58_v22  ;;  %721 = vmatprep.subr.mxu1 %v58_v22 }
  0x34   :  { %169 = vmatpush1.msra.mxu0 %v57_v23  ;;  %744 = vmatpush1.msra.mxu1 %v57_v23 }
  0x35   :  { %170 = vmatprep.subr.mxu0 %v56_v24  ;;  %722 = vmatprep.subr.mxu1 %v56_v24 }
  0x36   :  { %171 = vmatpush1.msra.mxu0 %v55_v25  ;;  %745 = vmatpush1.msra.mxu1 %v55_v25 }
  0x37   :  { %172 = vmatprep.subr.mxu0 %v54_v26  ;;  %723 = vmatprep.subr.mxu1 %v54_v26 }
  0x38   :  { %173 = vmatpush1.msra.mxu0 %v53_v27  ;;  %746 = vmatpush1.msra.mxu1 %v53_v27 }
  0x39   :  { %174 = vmatprep.subr.mxu0 %v52_v28  ;;  %724 = vmatprep.subr.mxu1 %v52_v28 }
  0x3a   :  { %175 = vmatpush1.msra.mxu0 %v51_v29  ;;  %747 = vmatpush1.msra.mxu1 %v51_v29 }
  0x3b   :  { %176 = vmatprep.subr.mxu0 %v50_v30  ;;  %725 = vmatprep.subr.mxu1 %v50_v30 }
  0x3c   :  { %177 = vmatpush1.msra.mxu0 %v49_v31  ;;  %748 = vmatpush1.msra.mxu1 %v49_v31 }
  0x3d   :  { %196 = vmatprep.subr.mxu0 %v94_v32  ;;  %726 = vmatprep.subr.mxu1 %v94_v32 }
  0x3e   :  { %197 = vmatpush2.msra.mxu0 %v93_v33  ;;  %749 = vmatpush2.msra.mxu1 %v93_v33 }
  0x3f   :  { %198 = vmatprep.subr.mxu0 %v92_v34  ;;  %727 = vmatprep.subr.mxu1 %v92_v34 }
  0x40   :  { %199 = vmatpush2.msra.mxu0 %v91_v35  ;;  %750 = vmatpush2.msra.mxu1 %v91_v35 }
  0x41   :  { %200 = vmatprep.subr.mxu0 %v90_v36  ;;  %728 = vmatprep.subr.mxu1 %v90_v36 }
  0x42   :  { %201 = vmatpush2.msra.mxu0 %v89_v37  ;;  %751 = vmatpush2.msra.mxu1 %v89_v37 }
  0x43   :  { %202 = vmatprep.subr.mxu0 %v88_v38  ;;  %729 = vmatprep.subr.mxu1 %v88_v38 }
  0x44   :  { %203 = vmatpush2.msra.mxu0 %v87_v39  ;;  %752 = vmatpush2.msra.mxu1 %v87_v39 }
  0x45   :  { %204 = vmatprep.subr.mxu0 %v86_v40  ;;  %730 = vmatprep.subr.mxu1 %v86_v40 }
  0x46   :  { %205 = vmatpush2.msra.mxu0 %v85_v41  ;;  %753 = vmatpush2.msra.mxu1 %v85_v41 }
  0x47   :  { %206 = vmatprep.subr.mxu0 %v84_v42  ;;  %731 = vmatprep.subr.mxu1 %v84_v42 }
  0x48   :  { %207 = vmatpush2.msra.mxu0 %v83_v43  ;;  %754 = vmatpush2.msra.mxu1 %v83_v43 }
  0x49   :  { %208 = vmatprep.subr.mxu0 %v82_v44  ;;  %732 = vmatprep.subr.mxu1 %v82_v44 }
  0x4a   :  { %209 = vmatpush2.msra.mxu0 %v81_v45  ;;  %755 = vmatpush2.msra.mxu1 %v81_v45 }
  0x4b   :  { %700 = vmatprep.mubr.msk.f32.mxu0 %vm115_vm0, %v96_v46  ;;  %705 = vmatprep.mubr.msk.f32.mxu1 %vm115_vm0, %v106_v47 }
  0x4c   :  { %211 = vmatmul.mubr.f32.vlgmr.msra.gmra.mxu0 %v95_v48  ;;  %241 = vmatmul.mubr.f32.vlgmr.msra.gmra.mxu1 %v105_v49 }
  0x4d   :  { %701 = vmatprep.mubr.msk.f32.mxu0 %vm115_vm0, %v98_v50  ;;  %706 = vmatprep.mubr.msk.f32.mxu1 %vm115_vm0, %v108_v51 }
  0x50   :  { %217 = vmatmul.mubr.f32.gmra.mxu0 %v97_v52  ;;  %247 = vmatmul.mubr.f32.gmra.mxu1 %v107_v53 }
  0x51   :  { %702 = vmatprep.mubr.msk.f32.mxu0 %vm115_vm0, %v100_v54  ;;  %707 = vmatprep.mubr.msk.f32.mxu1 %vm115_vm0, %v110_v55 }
  0x54   :  { %223 = vmatmul.mubr.f32.gmra.mxu0 %v99_v56  ;;  %253 = vmatmul.mubr.f32.gmra.mxu1 %v109_v57 }
  0x55   :  { %703 = vmatprep.mubr.msk.f32.mxu0 %vm115_vm0, %v102_v58  ;;  %708 = vmatprep.mubr.msk.f32.mxu1 %vm115_vm0, %v112_v59 }
  0x58   :  { %229 = vmatmul.mubr.f32.gmra.mxu0 %v101_v60  ;;  %259 = vmatmul.mubr.f32.gmra.mxu1 %v111_v61 }
  0x59   :  { %704 = vmatprep.mubr.msk.f32.mxu0 %vm115_vm0, %v104_v62  ;;  %709 = vmatprep.mubr.msk.f32.mxu1 %vm115_vm0, %v114_v63 }
  0x5c   :  { %235 = vmatmul.mubr.f32.gmra.mxu0 %v103_v0  ;;  %265 = vmatmul.mubr.f32.gmra.mxu1 %v113_v1 }
 0x10c   :  { %v968_v2 = vpop.f32.mrf.mxu0  ;;  %v970_v3 = vpop.f32.mrf.mxu1 }
 0x10d   :  { %v322_v6 = vmul.f32 %v970_v3, %v970_v3  ;;  %v312_v19 = vmul.f32 %v968_v2, %v968_v2 }
 0x10e   :  { %v972_v4 = vpop.f32.mrf.mxu0  ;;  %v974_v5 = vpop.f32.mrf.mxu1 }
 0x10f   :  { %v313_v7 = vmul.f32 %v972_v4, %v972_v4  ;;  %v323_v8 = vmul.f32 %v974_v5, %v974_v5  ;;  %v292_v9 = vsel %vm271_vm1, %v974_v5, 0.0  ;;  %v272_v10 = vsel %vm271_vm1, %v972_v4, 0.0 }
 0x110   :  { %v986_v11 = vpop.f32.mrf.mxu0  ;;  %v293_v12 = vadd.f32 %v292_v9, %v970_v3  ;;  %v273_v13 = vadd.f32 %v272_v10, %v968_v2  ;;  %v990_v14 = vpop.f32.mrf.mxu1 }
 0x111   :  { %v352_v15 = vsel %vm271_vm1, %v323_v8, 0.0  ;;  %v332_v16 = vsel %vm271_vm1, %v313_v7, 0.0  ;;  %v314_v21 = vmul.f32 %v986_v11, %v986_v11  ;;  %v324_v41 = vmul.f32 %v990_v14, %v990_v14 }
 0x112   :  { %294 = vadd.xlane.f32.xlu1 %v293_v12  ;;  %274 = vadd.xlane.f32.xlu0 %v273_v13  ;;  %v994_v17 = vpop.f32.mrf.mxu0  ;;  %v353_v18 = vadd.f32 %v352_v15, %v322_v6  ;;  %v998_v20 = vpop.f32.mrf.mxu1  ;;  %v333_v23 = vadd.f32 %v332_v16, %v312_v19 }
 0x113   :  { %v315_v22 = vmul.f32 %v994_v17, %v994_v17  ;;  %v276_v27 = vsel %vm271_vm1, %v994_v17, 0.0  ;;  %v325_v34 = vmul.f32 %v998_v20, %v998_v20  ;;  %v296_v35 = vsel %vm271_vm1, %v998_v20, 0.0 }
 0x114   :  { %v1004_v24 = vpop.f32.mrf.mxu0  ;;  %v1006_v25 = vpop.f32.mrf.mxu1  ;;  %v277_v31 = vadd.f32 %v276_v27, %v986_v11  ;;  %v297_v40 = vadd.f32 %v296_v35, %v990_v14 }
 0x115   :  { %v336_v26 = vsel %vm271_vm1, %v315_v22, 0.0  ;;  %v356_v44 = vsel %vm271_vm1, %v325_v34, 0.0  ;;  %v316_v46 = vmul.f32 %v1004_v24, %v1004_v24  ;;  %v326_v47 = vmul.f32 %v1006_v25, %v1006_v25 }
 0x116   :  { %354 = vadd.xlane.f32.xlu1 %v353_v18  ;;  %334 = vadd.xlane.f32.xlu0 %v333_v23  ;;  %v337_v28 = vadd.f32 %v336_v26, %v314_v21  ;;  %v1011_v29 = vpop.f32.mrf.mxu0  ;;  %v1016_v32 = vpop.f32.mrf.mxu1  ;;  %v357_v50 = vadd.f32 %v356_v44, %v324_v41 }
 0x117   :  { %v280_v30 = vsel %vm271_vm1, %v1011_v29, 0.0  ;;  %v317_v37 = vmul.f32 %v1011_v29, %v1011_v29  ;;  %v327_v38 = vmul.f32 %v1016_v32, %v1016_v32  ;;  %v300_v39 = vsel %vm271_vm1, %v1016_v32, 0.0 }
 0x118   :  { %v1018_v33 = vpop.f32.mrf.mxu0  ;;  %v281_v36 = vadd.f32 %v280_v30, %v1004_v24  ;;  %v1034_v42 = vpop.f32.mrf.mxu1  ;;  %v301_v45 = vadd.f32 %v300_v39, %v1006_v25 }
 0x119   :  { %v340_v48 = vsel %vm271_vm1, %v317_v37, 0.0  ;;  %v360_v49 = vsel %vm271_vm1, %v327_v38, 0.0  ;;  %v318_v62 = vmul.f32 %v1018_v33, %v1018_v33  ;;  %v328_v22 = vmul.f32 %v1034_v42, %v1034_v42 }
 0x11a   :  { %338 = vadd.xlane.f32.xlu1 %v337_v28  ;;  %278 = vadd.xlane.f32.xlu0 %v277_v31  ;;  %v1036_v43 = vpop.f32.mrf.mxu0  ;;  %v1046_v51 = vpop.f32.mrf.mxu1  ;;  %v341_v53 = vadd.f32 %v340_v48, %v316_v46  ;;  %v361_v54 = vadd.f32 %v360_v49, %v326_v47  ;;  %v854_v28 = vmov 0  }
 0x11b   :  { %v319_v55 = vmul.f32 %v1036_v43, %v1036_v43  ;;  %v304_v56 = vsel %vm271_vm1, %v1046_v51, 0.0  ;;  %v284_v57 = vsel %vm271_vm1, %v1036_v43, 0.0  ;;  %v329_v15 = vmul.f32 %v1046_v51, %v1046_v51  ;;  %763 = vset.pattern.permute.xlu1 %v854_v28  ;;  %762 = vset.pattern.permute.xlu0 %v854_v28 }
 0x11c   :  { %v1048_v52 = vpop.f32.mrf.mxu0  ;;  %v1058_v59 = vpop.f32.mrf.mxu1  ;;  %v305_v60 = vadd.f32 %v304_v56, %v1034_v42  ;;  %v285_v61 = vadd.f32 %v284_v57, %v1018_v33 }
 0x11d   :  { %v344_v1 = vsel %vm271_vm1, %v319_v55, 0.0  ;;  %v320_v9 = vmul.f32 %v1048_v52, %v1048_v52  ;;  %v330_v19 = vmul.f32 %v1058_v59, %v1058_v59  ;;  %v364_v23 = vsel %vm271_vm1, %v329_v15, 0.0 }
 0x11e   :  { %298 = vadd.xlane.f32.xlu0 %v297_v40  ;;  %282 = vadd.xlane.f32.xlu1 %v281_v36  ;;  %v1056_v58 = vpop.f32.mrf.mxu0  ;;  %v1069_v6 = vpop.f32.mrf.mxu1  ;;  %v345_v7 = vadd.f32 %v344_v1, %v318_v62  ;;  %v365_v27 = vadd.f32 %v364_v23, %v328_v22 }
 0x11f   :  { %v288_v63 = vsel %vm271_vm1, %v1056_v58, 0.0  ;;  %v321_v0 = vmul.f32 %v1056_v58, %v1056_v58  ;;  %v308_v10 = vsel %vm271_vm1, %v1069_v6, 0.0  ;;  %v331_v12 = vmul.f32 %v1069_v6, %v1069_v6 }
 0x120   :  { %v289_v8 = vadd.f32 %v288_v63, %v1048_v52  ;;  %v309_v16 = vadd.f32 %v308_v10, %v1058_v59 }
 0x121   :  { %v348_v13 = vsel %vm271_vm1, %v321_v0, 0.0  ;;  %v368_v21 = vsel %vm271_vm1, %v331_v12, 0.0 }
 0x122   :  { %358 = vadd.xlane.f32.xlu0 %v357_v50  ;;  %302 = vadd.xlane.f32.xlu1 %v301_v45  ;;  %v349_v18 = vadd.f32 %v348_v13, %v320_v9  ;;  %v369_v26 = vadd.f32 %v368_v21, %v330_v19  ;;  %v417_v21 = vld [vmem:[%s1221_s2 + $0x28] sm:$0xff] }
 0x126   :  { %342 = vadd.xlane.f32.xlu0 %v341_v53  ;;  %362 = vadd.xlane.f32.xlu1 %v361_v54 }
 0x12a   :  { %306 = vadd.xlane.f32.xlu0 %v305_v60  ;;  %286 = vadd.xlane.f32.xlu1 %v285_v61 }
 0x12e   :  { %346 = vadd.xlane.f32.xlu1 %v345_v7  ;;  %290 = vadd.xlane.f32.xlu0 %v289_v8 }
 0x132   :  { %310 = vadd.xlane.f32.xlu1 %v309_v16  ;;  %350 = vadd.xlane.f32.xlu0 %v349_v18 }
 0x136   :  { %370 = vadd.xlane.f32.xlu1 %v369_v26  ;;  %366 = vadd.xlane.f32.xlu0 %v365_v27  ;;  %v412_v26 = vld [vmem:[%s1221_s2] sm:$0xff] }
 0x19b   :  { %v295_v30 = vpop.xlane.xlu1 %294  ;;  %v275_v31 = vpop.xlane.xlu0 %274 }
 0x19c   :  { %v377_v34 = vmul.f32 0.0051020407, %v295_v30  ;;  %v1088_v35 = vmul.f32 0.0051020407, %v275_v31 }
 0x19e   :  { %v397_v36 = vmul.f32 %v377_v34, %v377_v34  ;;  %v392_v39 = vmul.f32 %v1088_v35, %v1088_v35 }
 0x19f   :  { %v355_v37 = vpop.xlane.xlu1 %354  ;;  %v335_v38 = vpop.xlane.xlu0 %334 }
 0x1a0   :  { %v387_v40 = vmul.f32 0.0051020407, %v355_v37  ;;  %v382_v41 = vmul.f32 0.0051020407, %v335_v38 }
 0x1a2   :  { %v407_v44 = vsub.f32 %v387_v40, %v397_v36  ;;  %v402_v45 = vsub.f32 %v382_v41, %v392_v39  ;;  %v457_v41 = vld [vmem:[%s1222_s3 + $0x28] sm:$0xff] }
 0x1a3   :  { %v339_v46 = vpop.xlane.xlu1 %338  ;;  %v279_v47 = vpop.xlane.xlu0 %278 }
 0x1a4   :  { %v427_v48 = vadd.f32 0.001, %v407_v44  ;;  %v422_v49 = vadd.f32 0.001, %v402_v45  ;;  %v373_v50 = vmul.f32 0.0051020407, %v279_v47 }
 0x1a5   :  { %v383_v53 = vmul.f32 0.0051020407, %v339_v46 }
 0x1a6   :  { %764 = vrsqrt.f32 %v427_v48  ;;  %v393_v54 = vmul.f32 %v373_v50, %v373_v50  ;;  %v413_v48 = vld [vmem:[%s1221_s2 + $0x8] sm:$0xff] }
 0x1a7   :  { %766 = vrsqrt.f32 %v422_v49  ;;  %v299_v55 = vpop.xlane.xlu0 %298  ;;  %v283_v56 = vpop.xlane.xlu1 %282 }
 0x1a8   :  { %v1092_v57 = vmul.f32 0.0051020407, %v299_v55  ;;  %v403_v60 = vsub.f32 %v383_v53, %v393_v54  ;;  %v1094_v61 = vmul.f32 0.0051020407, %v283_v56 }
 0x1aa   :  { %v423_v62 = vadd.f32 0.001, %v403_v60  ;;  %v398_v1 = vmul.f32 %v1092_v57, %v1092_v57  ;;  %v394_v9 = vmul.f32 %v1094_v61, %v1094_v61 }
 0x1ab   :  { %v359_v63 = vpop.xlane.xlu0 %358  ;;  %v303_v0 = vpop.xlane.xlu1 %302 }
 0x1ac   :  { %v388_v7 = vmul.f32 0.0051020407, %v359_v63  ;;  %v1098_v8 = vmul.f32 0.0051020407, %v303_v0  ;;  %768 = vrsqrt.f32 %v423_v62 }
 0x1ae   :  { %v408_v10 = vsub.f32 %v388_v7, %v398_v1  ;;  %v399_v12 = vmul.f32 %v1098_v8, %v1098_v8  ;;  %v453_v7 = vld [vmem:[%s1222_s3 + $0x8] sm:$0xff] }
 0x1af   :  { %v343_v13 = vpop.xlane.xlu0 %342  ;;  %v363_v15 = vpop.xlane.xlu1 %362 }
 0x1b0   :  { %v428_v16 = vadd.f32 0.001, %v408_v10  ;;  %v384_v18 = vmul.f32 0.0051020407, %v343_v13  ;;  %v389_v19 = vmul.f32 0.0051020407, %v363_v15 }
 0x1b1   :  { %v418_v10 = vld [vmem:[%s1221_s2 + $0x30] sm:$0xff] }
 0x1b2   :  { %770 = vrsqrt.f32 %v428_v16  ;;  %v404_v22 = vsub.f32 %v384_v18, %v394_v9  ;;  %v409_v23 = vsub.f32 %v389_v19, %v399_v12 }
 0x1b3   :  { %v765_v27 = vpop.eup %764  ;;  %v307_v28 = vpop.xlane.xlu0 %306 }
 0x1b4   :  { %v287_v30 = vpop.xlane.xlu1 %286  ;;  %v767_v31 = vpop.eup %766  ;;  %v424_v36 = vadd.f32 0.001, %v404_v22  ;;  %v429_v37 = vadd.f32 0.001, %v409_v23  ;;  %v447_v38 = vmul.f32 %v765_v27, %v417_v21  ;;  %v1120_v55 = vmul.f32 0.0051020407, %v307_v28 }
 0x1b5   :  { %v1110_v39 = vmul.f32 0.0051020407, %v287_v30  ;;  %v442_v40 = vmul.f32 %v767_v31, %v412_v26  ;;  %v452_v28 = vld [vmem:[%s1222_s3] sm:$0xff] }
 0x1b6   :  { %509 = vperm.xlu1 %763, %v447_v38   ;;  %v467_v44 = vmul.f32 %v447_v38, %v377_v34  ;;  %772 = vrsqrt.f32 %v429_v37  ;;  %v400_v12 = vmul.f32 %v1120_v55, %v1120_v55 }
 0x1b7   :  { %v395_v45 = vmul.f32 %v1110_v39, %v1110_v39  ;;  %484 = vperm.xlu0 %762, %v442_v40   ;;  %v291_v47 = vpop.xlane.xlu0 %290  ;;  %774 = vrsqrt.f32 %v424_v36  ;;  %v462_v23 = vmul.f32 %v442_v40, %v1088_v35  ;;  %v419_v36 = vld [vmem:[%s1221_s2 + $0x38] sm:$0xff] }
 0x1b8   :  { %v347_v46 = vpop.xlane.xlu1 %346  ;;  %v477_v53 = vsub.f32 %v457_v41, %v467_v44  ;;  %v1122_v34 = vmul.f32 0.0051020407, %v291_v47  ;;  %v459_v47 = vld [vmem:[%s1222_s3 + $0x38] sm:$0xff] }
 0x1b9   :  { %v385_v49 = vmul.f32 0.0051020407, %v347_v46  ;;  %v769_v54 = vpop.eup %768  ;;  %v472_v40 = vsub.f32 %v452_v28, %v462_v23  ;;  %v454_v23 = vld [vmem:[%s1222_s3 + $0x10] sm:$0xff]  ;;  %v456_v28 = vld [vmem:[%s1222_s3 + $0x20] sm:$0xff] }
 0x1ba   :  { %v443_v60 = vmul.f32 %v769_v54, %v413_v48  ;;  %v396_v16 = vmul.f32 %v1122_v34, %v1122_v34 }
 0x1bb   :  { %v405_v56 = vsub.f32 %v385_v49, %v395_v45  ;;  %579 = vperm.xlu0 %762, %v477_v53   ;;  %v351_v63 = vpop.xlane.xlu0 %350  ;;  %v414_v45 = vld [vmem:[%s1221_s2 + $0x10] sm:$0xff] }
 0x1bc   :  { %v311_v62 = vpop.xlane.xlu1 %310  ;;  %v463_v9 = vmul.f32 %v443_v60, %v373_v50  ;;  %489 = vperm.xlu1 %763, %v443_v60   ;;  %v386_v18 = vmul.f32 0.0051020407, %v351_v63  ;;  %v415_v63 = vld [vmem:[%s1221_s2 + $0x18] sm:$0xff] }
 0x1bd   :  { %v425_v0 = vadd.f32 0.001, %v405_v56  ;;  %v381_v1 = vmul.f32 0.0051020407, %v311_v62  ;;  %v458_v62 = vld [vmem:[%s1222_s3 + $0x30] sm:$0xff] }
 0x1be   :  { %v473_v22 = vsub.f32 %v453_v7, %v463_v9  ;;  %v406_v38 = vsub.f32 %v386_v18, %v396_v16  ;;  %v421_v7 = vld [vmem:[%s1221_s2 + $0x48] sm:$0xff] }
 0x1bf   :  { %v401_v13 = vmul.f32 %v381_v1, %v381_v1  ;;  %v771_v15 = vpop.eup %770  ;;  %v367_v21 = vpop.xlane.xlu0 %366  ;;  %776 = vrsqrt.f32 %v425_v0 }
 0x1c0   :  { %v371_v19 = vpop.xlane.xlu1 %370  ;;  %v390_v26 = vmul.f32 0.0051020407, %v367_v21  ;;  %v448_v27 = vmul.f32 %v771_v15, %v418_v10  ;;  %559 = vperm.xlu0 %762, %v473_v22   ;;  %v426_v49 = vadd.f32 0.001, %v406_v38  ;;  %v420_v15 = vld [vmem:[%s1221_s2 + $0x40] sm:$0xff] }
 0x1c1   :  { %v391_v50 = vmul.f32 0.0051020407, %v371_v19 }
 0x1c2   :  { %v410_v31 = vsub.f32 %v390_v26, %v400_v12  ;;  %514 = vperm.xlu1 %763, %v448_v27   ;;  %v468_v56 = vmul.f32 %v448_v27, %v1092_v57 }
 0x1c3   :  { %v411_v30 = vsub.f32 %v391_v50, %v401_v13  ;;  %v773_v37 = vpop.eup %772  ;;  %v455_v13 = vld [vmem:[%s1222_s3 + $0x18] sm:$0xff]  ;;  %v416_v50 = vld [vmem:[%s1221_s2 + $0x20] sm:$0xff]  ;;  %s855_s2 = smov [#allocation7]  }
 0x1c4   :  { %v430_v35 = vadd.f32 0.001, %v410_v31  ;;  %v775_v44 = vpop.eup %774  ;;  %v449_v46 = vmul.f32 %v773_v37, %v419_v36  ;;  %v460_v36 = vld [vmem:[%s1222_s3 + $0x40] sm:$0xff] }
 0x1c5   :  { %v431_v41 = vadd.f32 0.001, %v411_v30  ;;  %v444_v53 = vmul.f32 %v775_v44, %v414_v45  ;;  %v633_v44 = vld [vmem:[#allocation5 + $0x58] sm:$0xff] }
 0x1c6   :  { %554 = vperm.xlu1 %763, %v472_v40   ;;  %v469_v48 = vmul.f32 %v449_v46, %v1098_v8  ;;  %v478_v8 = vsub.f32 %v458_v62, %v468_v56  ;;  %v632_v40 = vld [vmem:[#allocation5 + $0x50] sm:$0xff] }
 0x1c7   :  { %778 = vrsqrt.f32 %v431_v41  ;;  %v464_v21 = vmul.f32 %v444_v53, %v1094_v61  ;;  %v624_v56 = vld [vmem:[#allocation5 + $0x10] sm:$0xff] }
 0x1c8   :  { %780 = vrsqrt.f32 %v430_v35  ;;  %v479_v54 = vsub.f32 %v459_v47, %v469_v48 }
 0x1c9   :  { %782 = vrsqrt.f32 %v426_v49  ;;  %v474_v27 = vsub.f32 %v454_v23, %v464_v21  ;;  %v636_v21 = vld [vmem:[#allocation5 + $0x70] sm:$0xff] }
 0x1ca   :  { %494 = vperm.xlu1 %763, %v444_v53   ;;  %589 = vperm.xlu0 %762, %v479_v54  }
 0x1cc   :  { %v777_v60 = vpop.eup %776 }
 0x1cd   :  { %v445_v0 = vmul.f32 %v777_v60, %v415_v63  ;;  %v625_v60 = vld [vmem:[#allocation5 + $0x18] sm:$0xff] }
 0x1ce   :  { %519 = vperm.xlu1 %763, %v449_v46  }
 0x1cf   :  { %v465_v57 = vmul.f32 %v445_v0, %v1110_v39  ;;  %v461_v39 = vld [vmem:[%s1222_s3 + $0x48] sm:$0xff]  ;;  %s687_s3 = sshll.u32 %s855_s2, 4  ;;  %s688_s3 = int_to_ptr.vmem [resolvable:$true] %s687_s3 }
 0x1d0   :  { %s824_s6 = scalar_lea.vmem %s688_s3, 2560  ;;  %p829_p11 = scmp.lt.s32.totalorder %s688_s3, %s688_s3 }
 0x1d1   :  { %v475_v16 = vsub.f32 %v455_v13, %v465_v57  ;;  %v623_v57 = vld [vmem:[#allocation5 + $0x8] sm:$0xff]  ;;  %p825_p10 = scmp.ne.s32.totalorder %s688_s3, %s824_s6  ;;  %p830_p12 = scmp.lt.s32.totalorder %s824_s6, %s824_s6 }
 0x1d2   :  { %584 = vperm.xlu1 %763, %v478_v8  }
 0x1d3   :  { %p831_p13 = por %p830_p12, %p829_p11 }
 0x1d4   :  { %v779_v9 = vpop.eup %778 }
 0x1d5   :  { %v451_v10 = vmul.f32 %v779_v9, %v421_v7  ;;  %v781_v12 = vpop.eup %780  ;;  %p832_p0 = pnand %p831_p13, %p825_p10 }
 0x1d6   :  { %499 = vperm.xlu1 %763, %v445_v0   ;;  %v450_v18 = vmul.f32 %v781_v12, %v420_v15  ;;  %v783_v22 = vpop.eup %782 }
 0x1d7   :  { %529 = vperm.xlu0 %762, %v451_v10   ;;  %v471_v19 = vmul.f32 %v451_v10, %v381_v1  ;;  %v446_v1 = vmul.f32 %v783_v22, %v416_v50  ;;  %v622_v10 = vld [vmem:[#allocation5] sm:$0xff]  ;;  %v637_v22 = vld [vmem:[#allocation5 + $0x78] sm:$0xff] }
 0x1d8   :  { %v470_v31 = vmul.f32 %v450_v18, %v1120_v55 }
 0x1d9   :  { %v481_v26 = vsub.f32 %v461_v39, %v471_v19  ;;  %v466_v61 = vmul.f32 %v446_v1, %v1122_v34 }
 0x1da   :  { %524 = vperm.xlu1 %763, %v450_v18   ;;  %v480_v37 = vsub.f32 %v460_v36, %v470_v31 }
 0x1db   :  { %569 = vperm.xlu0 %762, %v475_v16   ;;  %v476_v30 = vsub.f32 %v456_v28, %v466_v61 }
 0x1de   :  { %564 = vperm.xlu1 %763, %v474_v27   ;;  %v634_v27 = vld [vmem:[#allocation5 + $0x60] sm:$0xff] }
 0x1df   :  { %599 = vperm.xlu0 %762, %v481_v26  }
 0x1e2   :  { %504 = vperm.xlu1 %763, %v446_v1   ;;  %v635_v1 = vld [vmem:[#allocation5 + $0x68] sm:$0xff] }
 0x1e6   :  { %574 = vperm.xlu1 %763, %v476_v30  }
 0x1ea   :  { %594 = vperm.xlu1 %763, %v480_v37  }
 0x231   :  { %v510_v38 = vpop.permute.xlu1 %509 }
 0x232   :  { %v485_v41 = vpop.permute.xlu0 %484  ;;  %v542_v35 = vmul.f32 %v510_v38, %v970_v3  ;;  %v543_v34 = vmul.f32 %v510_v38, %v974_v5 }
 0x233   :  { %v532_v7 = vmul.f32 %v485_v41, %v968_v2  ;;  %v533_v9 = vmul.f32 %v485_v41, %v972_v4 }
 0x236   :  { %v580_v45 = vpop.permute.xlu0 %579 }
 0x237   :  { %v612_v46 = vadd.f32 %v580_v45, %v542_v35  ;;  %v613_v47 = vadd.f32 %v580_v45, %v543_v34  ;;  %v490_v48 = vpop.permute.xlu1 %489  ;;  %v628_v35 = vld [vmem:[#allocation5 + $0x30] sm:$0xff]  ;;  %v629_v34 = vld [vmem:[#allocation5 + $0x38] sm:$0xff] }
 0x238   :  { %v534_v53 = vmul.f32 %v490_v48, %v986_v11  ;;  %v535_v54 = vmul.f32 %v490_v48, %v994_v17 }
 0x239   :  { %v652_v55 = vadd.f32 %v632_v40, %v612_v46  ;;  %v653_v49 = vadd.f32 %v633_v44, %v613_v47 }
 0x23b   :  { %672 = vst [vmem:[#allocation7 + $0x50] sm:$0xff] %v652_v55  ;;  %673 = vst.msk [vmem:[#allocation7 + $0x58] sm:$0xff] %vm271_vm1, %v653_v49  ;;  %v560_v3 = vpop.permute.xlu0 %559 }
 0x23c   :  { %v604_v62 = vadd.f32 %v560_v3, %v534_v53  ;;  %v605_v5 = vadd.f32 %v560_v3, %v535_v54  ;;  %v626_v54 = vld [vmem:[#allocation5 + $0x20] sm:$0xff] }
 0x23d   :  { %v515_v63 = vpop.permute.xlu1 %514 }
 0x23e   :  { %v644_v8 = vadd.f32 %v624_v56, %v604_v62  ;;  %v645_v0 = vadd.f32 %v625_v60, %v605_v5  ;;  %v544_v39 = vmul.f32 %v515_v63, %v990_v14  ;;  %v545_v23 = vmul.f32 %v515_v63, %v998_v20  ;;  %v641_v60 = vld [vmem:[#allocation5 + $0x98] sm:$0xff] }
 0x240   :  { %664 = vst [vmem:[#allocation7 + $0x10] sm:$0xff] %v644_v8  ;;  %665 = vst.msk [vmem:[#allocation7 + $0x18] sm:$0xff] %vm271_vm1, %v645_v0 }
 0x241   :  { %v555_v11 = vpop.permute.xlu1 %554 }
 0x242   :  { %v602_v12 = vadd.f32 %v555_v11, %v532_v7  ;;  %v603_v17 = vadd.f32 %v555_v11, %v533_v9 }
 0x244   :  { %v642_v13 = vadd.f32 %v622_v10, %v602_v12  ;;  %v643_v15 = vadd.f32 %v623_v57, %v603_v17  ;;  %v630_v10 = vld [vmem:[#allocation5 + $0x40] sm:$0xff]  ;;  %v631_v57 = vld [vmem:[#allocation5 + $0x48] sm:$0xff] }
 0x245   :  { %v495_v16 = vpop.permute.xlu1 %494  ;;  %v590_v4 = vpop.permute.xlu0 %589 }
 0x246   :  { %662 = vst [vmem:[#allocation7] sm:$0xff] %v642_v13  ;;  %663 = vst.msk [vmem:[#allocation7 + $0x8] sm:$0xff] %vm271_vm1, %v643_v15  ;;  %v536_v46 = vmul.f32 %v495_v16, %v1004_v24  ;;  %v537_v47 = vmul.f32 %v495_v16, %v1011_v29 }
 0x249   :  { %v520_v18 = vpop.permute.xlu1 %519 }
 0x24a   :  { %v546_v19 = vmul.f32 %v520_v18, %v1006_v25  ;;  %v547_v2 = vmul.f32 %v520_v18, %v1016_v32 }
 0x24c   :  { %v616_v50 = vadd.f32 %v590_v4, %v546_v19  ;;  %v617_v26 = vadd.f32 %v590_v4, %v547_v2  ;;  %v638_v19 = vld [vmem:[#allocation5 + $0x80] sm:$0xff]  ;;  %v639_v2 = vld [vmem:[#allocation5 + $0x88] sm:$0xff] }
 0x24d   :  { %v585_v61 = vpop.permute.xlu1 %584 }
 0x24e   :  { %v656_v28 = vadd.f32 %v636_v21, %v616_v50  ;;  %v657_v30 = vadd.f32 %v637_v22, %v617_v26  ;;  %v614_v31 = vadd.f32 %v585_v61, %v544_v39  ;;  %v615_v36 = vadd.f32 %v585_v61, %v545_v23 }
 0x250   :  { %676 = vst [vmem:[#allocation7 + $0x70] sm:$0xff] %v656_v28  ;;  %677 = vst.msk [vmem:[#allocation7 + $0x78] sm:$0xff] %vm271_vm1, %v657_v30  ;;  %v654_v25 = vadd.f32 %v634_v27, %v614_v31  ;;  %v655_v32 = vadd.f32 %v635_v1, %v615_v36 }
 0x251   :  { %v500_v37 = vpop.permute.xlu1 %499 }
 0x252   :  { %v530_v38 = vpop.permute.xlu0 %529  ;;  %674 = vst [vmem:[#allocation7 + $0x60] sm:$0xff] %v654_v25  ;;  %675 = vst.msk [vmem:[#allocation7 + $0x68] sm:$0xff] %vm271_vm1, %v655_v32  ;;  %v538_v14 = vmul.f32 %v500_v37, %v1018_v33  ;;  %v539_v20 = vmul.f32 %v500_v37, %v1036_v43  ;;  %v627_v33 = vld [vmem:[#allocation5 + $0x28] sm:$0xff]  ;;  %v640_v43 = vld [vmem:[#allocation5 + $0x90] sm:$0xff] }
 0x253   :  { %v550_v48 = vmul.f32 %v530_v38, %v1058_v59  ;;  %v551_v55 = vmul.f32 %v530_v38, %v1069_v6 }
 0x255   :  { %v525_v41 = vpop.permute.xlu1 %524 }
 0x256   :  { %v570_v40 = vpop.permute.xlu0 %569  ;;  %v548_v13 = vmul.f32 %v525_v41, %v1034_v42  ;;  %v549_v15 = vmul.f32 %v525_v41, %v1046_v51 }
 0x257   :  { %v608_v44 = vadd.f32 %v570_v40, %v538_v14  ;;  %v609_v45 = vadd.f32 %v570_v40, %v539_v20 }
 0x259   :  { %v648_v49 = vadd.f32 %v628_v35, %v608_v44  ;;  %v649_v53 = vadd.f32 %v629_v34, %v609_v45  ;;  %v565_v56 = vpop.permute.xlu1 %564 }
 0x25a   :  { %v600_v3 = vpop.permute.xlu0 %599  ;;  %v606_v62 = vadd.f32 %v565_v56, %v536_v46  ;;  %v607_v5 = vadd.f32 %v565_v56, %v537_v47 }
 0x25b   :  { %668 = vst [vmem:[#allocation7 + $0x30] sm:$0xff] %v648_v49  ;;  %669 = vst.msk [vmem:[#allocation7 + $0x38] sm:$0xff] %vm271_vm1, %v649_v53  ;;  %v620_v24 = vadd.f32 %v600_v3, %v550_v48  ;;  %v621_v63 = vadd.f32 %v600_v3, %v551_v55 }
 0x25c   :  { %v646_v29 = vadd.f32 %v626_v54, %v606_v62  ;;  %v647_v8 = vadd.f32 %v627_v33, %v607_v5 }
 0x25d   :  { %v660_v59 = vadd.f32 %v640_v43, %v620_v24  ;;  %v661_v0 = vadd.f32 %v641_v60, %v621_v63  ;;  %v505_v6 = vpop.permute.xlu1 %504 }
 0x25e   :  { %666 = vst [vmem:[#allocation7 + $0x20] sm:$0xff] %v646_v29  ;;  %667 = vst.msk [vmem:[#allocation7 + $0x28] sm:$0xff] %vm271_vm1, %v647_v8  ;;  %v540_v7 = vmul.f32 %v505_v6, %v1048_v52  ;;  %v541_v9 = vmul.f32 %v505_v6, %v1056_v58 }
 0x25f   :  { %680 = vst [vmem:[#allocation7 + $0x90] sm:$0xff] %v660_v59  ;;  %681 = vst.msk [vmem:[#allocation7 + $0x98] sm:$0xff] %vm271_vm1, %v661_v0 }
 0x261   :  { %v575_v11 = vpop.permute.xlu1 %574 }
 0x262   :  { %v610_v12 = vadd.f32 %v575_v11, %v540_v7  ;;  %v611_v17 = vadd.f32 %v575_v11, %v541_v9 }
 0x264   :  { %v650_v16 = vadd.f32 %v630_v10, %v610_v12  ;;  %v651_v18 = vadd.f32 %v631_v57, %v611_v17 }
 0x265   :  { %v595_v4 = vpop.permute.xlu1 %594 }
 0x266   :  { %670 = vst [vmem:[#allocation7 + $0x40] sm:$0xff] %v650_v16  ;;  %671 = vst.msk [vmem:[#allocation7 + $0x48] sm:$0xff] %vm271_vm1, %v651_v18  ;;  %v618_v52 = vadd.f32 %v595_v4, %v548_v13  ;;  %v619_v58 = vadd.f32 %v595_v4, %v549_v15 }
 0x268   :  { %v658_v21 = vadd.f32 %v638_v19, %v618_v52  ;;  %v659_v22 = vadd.f32 %v639_v2, %v619_v58 }
 0x26a   :  { %678 = vst [vmem:[#allocation7 + $0x80] sm:$0xff] %v658_v21  ;;  %679 = vst.msk [vmem:[#allocation7 + $0x88] sm:$0xff] %vm271_vm1, %v659_v22 }
 0x26b   :  { %835 = shalt.err (!%p832_p0)
}
 0x26c   :  { %693 = dma.vmem_to_hbm [thread:$0]  %s688_s3, 2560, %s1224_s5, [#allocation4], %s851_s21, %s851_s21, %s852_s22  }
 0x26d   :  { %848 = dma.done.wait [#allocation4], 2560  }
 0x26e   :  { %849 = vsyncadd [#allocation4], 4294964736 }
 0x26f   :  { %697 = vsyncpa [#allocation3], 1 }
 0x270   :  { %698 = vsyncpa [#allocation6], 1 }
 0x271   :  { %699 = vsyncpa [#allocation4], 1 }

</bundles_post_ra>
